<compile_context>
chip_gen: v6e
topology: v6e:2x2x1
jax: 0.10.0
libtpu: 0.0.40
codegen_flags: <defaults>
</compile_context>

<pallas_src>
import functools

import jax
import jax.numpy as jnp
from jax import lax
from jax.experimental import pallas as pl
from jax.experimental.pallas import tpu as pltpu


def _round_up(x: int, m: int) -> int:
    return ((x + m - 1) // m) * m


def _intent_classifier_kernel(x_ref, w_ref, b_ref, o_ref):
    # x_ref: (TM, Dp), w_ref: (Np, Dp)  [native nn.Linear layout, padded],
    # b_ref: (1, Np),  o_ref: (TM, Np)
    acc = lax.dot_general(
        x_ref[...],
        w_ref[...],
        dimension_numbers=(((1,), (1,)), ((), ())),
        preferred_element_type=jnp.float32,
    )
    o_ref[...] = (acc + b_ref[...]).astype(o_ref.dtype)


@functools.partial(jax.jit, static_argnames=("block_m",))
def intent_classifier(x, weight, bias, *, block_m: int = 256):
    """Pallas forward pass of IntentClassifier (eval mode).

    x:      [batch, input_dim]
    weight: [num_intent_labels, input_dim]   (PyTorch nn.Linear layout)
    bias:   [num_intent_labels]
    returns [batch, num_intent_labels]
    """
    batch, input_dim = x.shape
    num_labels = weight.shape[0]

    # Pad feature axes to 128 lanes, batch to a multiple of the batch tile.
    d_p = _round_up(input_dim, 128)
    n_p = _round_up(num_labels, 128)
    tm = block_m if batch >= block_m else _round_up(batch, 8)
    m_p = _round_up(batch, tm)

    x_p = jnp.pad(x, ((0, m_p - batch), (0, d_p - input_dim)))
    w_p = jnp.pad(weight, ((0, n_p - num_labels), (0, d_p - input_dim)))
    b_p = jnp.pad(bias, (0, n_p - num_labels)).reshape(1, n_p)

    grid = (m_p // tm,)

    out_p = pl.pallas_call(
        _intent_classifier_kernel,
        out_shape=jax.ShapeDtypeStruct((m_p, n_p), x.dtype),
        grid=grid,
        in_specs=[
            pl.BlockSpec((tm, d_p), lambda i: (i, 0)),      # x tile (pipelined)
            pl.BlockSpec((n_p, d_p), lambda i: (0, 0)),     # weight, resident
            pl.BlockSpec((1, n_p), lambda i: (0, 0)),       # bias, resident
        ],
        out_specs=pl.BlockSpec((tm, n_p), lambda i: (i, 0)),
        compiler_params=pltpu.CompilerParams(
            dimension_semantics=("parallel",)),
    )(x_p, w_p, b_p)

    return out_p[:batch, :num_labels]


if __name__ == "__main__":
    # Deterministic synthetic parameters, mimicking nn.Linear shapes.
    input_dim = 32
    num_intent_labels = 16
    batch = 8

    key = jax.random.PRNGKey(0)
    kx, kw, kb = jax.random.split(key, 3)

    x = jax.random.normal(kx, (batch, input_dim), dtype=jnp.float32)
    # nn.Linear(input_dim, num_intent_labels): weight (out, in), bias (out,)
    bound = 1.0 / (input_dim ** 0.5)
    weight = jax.random.uniform(
        kw, (num_intent_labels, input_dim), minval=-bound, maxval=bound,
        dtype=jnp.float32)
    bias = jax.random.uniform(
        kb, (num_intent_labels,), minval=-bound, maxval=bound,
        dtype=jnp.float32)

    out = intent_classifier(x, weight, bias)
    jax.block_until_ready(out)

    # Reference check against plain JAX (dropout_rate=0.0 -> identity).
    ref = x @ weight.T + bias
    assert out.shape == (batch, num_intent_labels)
    assert jnp.allclose(out, ref, atol=1e-5, rtol=1e-5)

    print("KERNEL_OK")
</pallas_src>

<mosaic_0001>
module attributes {stable_mosaic.version = 11 : i64} {
  func.func @_intent_classifier_kernel(%arg0: i32, %arg1: memref<8x128xf32, #tpu.memory_space<vmem>>, %arg2: memref<128x128xf32, #tpu.memory_space<vmem>>, %arg3: memref<1x128xf32, #tpu.memory_space<vmem>>, %arg4: memref<8x128xf32, #tpu.memory_space<vmem>>) attributes {dimension_semantics = [#tpu.dimension_semantics<parallel>], iteration_bounds = array<i64: 1>, scalar_prefetch = 0 : i64, scratch_operands = 0 : i64, tpu.core_type = #tpu.core_type<tc>, window_params = [{transform_indices = @transform_0, window_bounds = array<i64: 8, 128>}, {pipeline_mode = #tpu.pipeline_mode<synchronous>, transform_indices = @transform_1, window_bounds = array<i64: 128, 128>}, {pipeline_mode = #tpu.pipeline_mode<synchronous>, transform_indices = @transform_2, window_bounds = array<i64: 1, 128>}, {transform_indices = @transform_3, window_bounds = array<i64: 8, 128>}]} {
    %c0 = arith.constant 0 : index
    %c0_0 = arith.constant 0 : index
    %0 = vector.load %arg1[%c0, %c0_0] : memref<8x128xf32, #tpu.memory_space<vmem>>, vector<8x128xf32>
    %c0_1 = arith.constant 0 : index
    %c0_2 = arith.constant 0 : index
    %1 = vector.load %arg2[%c0_1, %c0_2] : memref<128x128xf32, #tpu.memory_space<vmem>>, vector<128x128xf32>
    %cst = arith.constant dense<0.000000e+00> : vector<8x128xf32>
    %2 = tpu.matmul %0, %1, %cst {dimension_numbers = #tpu.dot_dimension_numbers<[1], [1], [0], [0], [0, 0, 1, 0], [], []>} : vector<8x128xf32>, vector<128x128xf32>, vector<8x128xf32> -> vector<8x128xf32>
    %c0_3 = arith.constant 0 : index
    %c0_4 = arith.constant 0 : index
    %3 = vector.load %arg3[%c0_3, %c0_4] : memref<1x128xf32, #tpu.memory_space<vmem>>, vector<1x128xf32>
    %4 = vector.broadcast %3 : vector<1x128xf32> to vector<8x128xf32>
    %5 = arith.addf %2, %4 : vector<8x128xf32>
    %c0_5 = arith.constant 0 : index
    %c0_6 = arith.constant 0 : index
    %6 = vector.load %arg4[%c0_5, %c0_6] : memref<8x128xf32, #tpu.memory_space<vmem>>, vector<8x128xf32>
    tpu.vector_store %arg4[%c0_5, %c0_6], %5 {strides = array<i32>} : memref<8x128xf32, #tpu.memory_space<vmem>>, vector<8x128xf32>,
    return
  }
  func.func @transform_0(%arg0: i32) -> (i32, i32) {
    %c0_i32 = arith.constant 0 : i32
    %c0_i32_0 = arith.constant 0 : i32
    return %arg0, %c0_i32 : i32, i32
  }
  func.func @transform_1(%arg0: i32) -> (i32, i32) {
    %c0_i32 = arith.constant 0 : i32
    %c0_i32_0 = arith.constant 0 : i32
    %c0_i32_1 = arith.constant 0 : i32
    return %c0_i32, %c0_i32_0 : i32, i32
  }
  func.func @transform_2(%arg0: i32) -> (i32, i32) {
    %c0_i32 = arith.constant 0 : i32
    %c0_i32_0 = arith.constant 0 : i32
    %c0_i32_1 = arith.constant 0 : i32
    return %c0_i32, %c0_i32_0 : i32, i32
  }
  func.func @transform_3(%arg0: i32) -> (i32, i32) {
    %c0_i32 = arith.constant 0 : i32
    %c0_i32_0 = arith.constant 0 : i32
    return %arg0, %c0_i32 : i32, i32
  }
}

</mosaic_0001>

<bundles_post_ra>
// kernel: intent_classifier.1
= control target key start
LH: loop header
LB: loop body
LE: loop exit
PB: predicated region body
PF: predicated region fallthrough
CT: control target
= control target key end

     0   :  { %v202_v1 = vmov 0.0   ;;  %vm203_vm0 = vmmov 0   ;;  %s282_s0 = inlined_call_operand.vmem [shape: f32[8,128], index: 0, kind: input, shape index: {}]   ;;  %s283_s1 = inlined_call_operand.vmem [shape: f32[128,128], index: 1, kind: input, shape index: {}]   ;;  %s284_s2 = inlined_call_operand.vmem [shape: f32[1,128], index: 2, kind: input, shape index: {}]   ;;  %s285_s3 = inlined_call_operand.hbm [shape: f32[8,128], index: 3, kind: output, shape index: {}]  }
   0x1   :  { %v31_v0 = vld [vmem:[%s283_s1 + $0x78] sm:$0xff]  ;;  %142 = vmatprep.subr.mxu0 %v202_v1  ;;  %174 = vmatprep.mubr.msk.f32.mxu0 %vm203_vm0, %v202_v1  ;;  %v30_v2 = vld [vmem:[%s283_s1 + $0x70] sm:$0xff] }
   0x2   :  { %143 = vmatpush3.xpose.msra.mxu0 %v31_v0 }
   0x3   :  { %144 = vmatprep.subr.mxu0 %v202_v1 }
   0x6   :  { %145 = vmatpush3.xpose.msra.mxu0 %v30_v2 }
   0x7   :  { %8 = vsyncpa [#allocation3], 0  ;;  %146 = vmatprep.subr.mxu0 %v202_v1  ;;  %v29_v3 = vld [vmem:[%s283_s1 + $0x68] sm:$0xff]  ;;  %v28_v4 = vld [vmem:[%s283_s1 + $0x60] sm:$0xff]  ;;  %s204_s21 = smov [#allocation2]  }
   0x8   :  { %v27_v5 = vld [vmem:[%s283_s1 + $0x58] sm:$0xff]  ;;  %v26_v6 = vld [vmem:[%s283_s1 + $0x50] sm:$0xff]  ;;  %v25_v7 = vld [vmem:[%s283_s1 + $0x48] sm:$0xff]  ;;  %s116_s22 = sshll.u32 %s204_s21, 4  ;;  %s117_s22 = int_to_ptr.vmem [resolvable:$true] %s116_s22 }
   0x9   :  { %v24_v8 = vld [vmem:[%s283_s1 + $0x40] sm:$0xff]  ;;  %v23_v9 = vld [vmem:[%s283_s1 + $0x38] sm:$0xff]  ;;  %v22_v10 = vld [vmem:[%s283_s1 + $0x30] sm:$0xff]  ;;  %s180_s23 = scalar_lea.vmem %s117_s22, 128  ;;  %p185_p1 = scmp.lt.s32.totalorder %s117_s22, %s117_s22 }
   0xa   :  { %147 = vmatpush3.xpose.msra.mxu0 %v29_v3  ;;  %v21_v11 = vld [vmem:[%s283_s1 + $0x28] sm:$0xff]  ;;  %v20_v12 = vld [vmem:[%s283_s1 + $0x20] sm:$0xff]  ;;  %v19_v13 = vld [vmem:[%s283_s1 + $0x18] sm:$0xff]  ;;  %p181_p0 = scmp.ne.s32.totalorder %s117_s22, %s180_s23  ;;  %p186_p2 = scmp.lt.s32.totalorder %s180_s23, %s180_s23 }
   0xb   :  { %148 = vmatprep.subr.mxu0 %v202_v1  ;;  %v18_v14 = vld [vmem:[%s283_s1 + $0x10] sm:$0xff]  ;;  %v17_v15 = vld [vmem:[%s283_s1 + $0x8] sm:$0xff]  ;;  %v16_v16 = vld [vmem:[%s283_s1] sm:$0xff] }
   0xc   :  { %v15_v17 = vld [vmem:[%s282_s0] sm:$0xff]  ;;  %p187_p3 = por %p186_p2, %p185_p1 }
   0xd   :  { %v124_v18 = vld [vmem:[%s284_s2] ss:$0 sm:$0xff] }
   0xe   :  { %149 = vmatpush3.xpose.msra.mxu0 %v28_v4  ;;  %p188_p4 = pnand %p187_p3, %p181_p0 }
   0xf   :  { %150 = vmatprep.subr.mxu0 %v202_v1 }
  0x12   :  { %151 = vmatpush3.xpose.msra.mxu0 %v27_v5 }
  0x13   :  { %152 = vmatprep.subr.mxu0 %v202_v1 }
  0x16   :  { %153 = vmatpush3.xpose.msra.mxu0 %v26_v6 }
  0x17   :  { %154 = vmatprep.subr.mxu0 %v202_v1 }
  0x1a   :  { %155 = vmatpush3.xpose.msra.mxu0 %v25_v7 }
  0x1b   :  { %156 = vmatprep.subr.mxu0 %v202_v1 }
  0x1e   :  { %157 = vmatpush3.xpose.msra.mxu0 %v24_v8 }
  0x1f   :  { %158 = vmatprep.subr.mxu0 %v202_v1 }
  0x22   :  { %159 = vmatpush3.xpose.msra.mxu0 %v23_v9 }
  0x23   :  { %160 = vmatprep.subr.mxu0 %v202_v1 }
  0x26   :  { %161 = vmatpush3.xpose.msra.mxu0 %v22_v10 }
  0x27   :  { %162 = vmatprep.subr.mxu0 %v202_v1 }
  0x2a   :  { %163 = vmatpush3.xpose.msra.mxu0 %v21_v11 }
  0x2b   :  { %164 = vmatprep.subr.mxu0 %v202_v1 }
  0x2e   :  { %165 = vmatpush3.xpose.msra.mxu0 %v20_v12 }
  0x2f   :  { %166 = vmatprep.subr.mxu0 %v202_v1 }
  0x32   :  { %167 = vmatpush3.xpose.msra.mxu0 %v19_v13 }
  0x33   :  { %168 = vmatprep.subr.mxu0 %v202_v1 }
  0x36   :  { %169 = vmatpush3.xpose.msra.mxu0 %v18_v14 }
  0x37   :  { %170 = vmatprep.subr.mxu0 %v202_v1 }
  0x3a   :  { %171 = vmatpush3.xpose.msra.mxu0 %v17_v15 }
  0x3b   :  { %172 = vmatprep.subr.mxu0 %v202_v1 }
  0x3e   :  { %173 = vmatpush3.xpose.msra.mxu0 %v16_v16 }
  0x41   :  { %175 = vmatmul.mubr.f32.vlgmr.msra.gmra.mxu0 %v15_v17 }
 0x101   :  { %v105_v19 = vpop.f32.mrf.mxu0 }
 0x102   :  { %v106_v20 = vadd.f32 %v124_v18, %v105_v19 }
 0x103   :  { %v176_v21 = vpop.f32.mrf.mxu0 }
 0x104   :  { %109 = vst [vmem:[#allocation2] sm:$0xff] %v106_v20 }
 0x105   :  { %191 = shalt.err (!%p188_p4)
}
 0x106   :  { %119 = dma.vmem_to_hbm [thread:$0]  %s117_s22, 128, %s285_s3, [#allocation3]  }
 0x107   :  { %200 = dma.done.wait [#allocation3], 128  }
 0x108   :  { %201 = vsyncadd [#allocation3], 4294967168 }
 0x109   :  { %123 = vsyncpa [#allocation3], 1 }

</bundles_post_ra>
